<compile_context>
chip_gen: v7x
topology: tpu7x:2x2x1
jax: 0.10.0
libtpu: 0.0.40
codegen_flags: <defaults>
</compile_context>

<pallas_src>
import functools

import jax
import jax.numpy as jnp
from jax.experimental import pallas as pl
from jax.experimental.pallas import tpu as pltpu


def _round_up(x, m):
    return ((x + m - 1) // m) * m


def _vmem_capacity_bytes():
    """Best-effort per-core VMEM capacity query (conservative fallback)."""
    try:
        info = pltpu.get_tpu_info()
        cap = getattr(info, "vmem_capacity_bytes", None)
        if cap:
            return int(cap)
    except Exception:
        pass
    return 64 << 20  # conservative (v7x per-TC budget)


def _spec(block_shape, index_map, *, single_buffered=False):
    """BlockSpec helper; requests single buffering for grid-invariant inputs."""
    if single_buffered:
        try:
            return pl.BlockSpec(block_shape, index_map,
                                pipeline_mode=pl.Buffered(1))
        except Exception:
            pass  # older jax without pipeline_mode/Buffered: fall back
    return pl.BlockSpec(block_shape, index_map)


def _layernorm_f32(x_ref, g_ref, b_ref):
    x = x_ref[...].astype(jnp.float32)                       # (tm, D)
    mean = jnp.mean(x, axis=-1, keepdims=True)
    xc = x - mean
    var = jnp.mean(xc * xc, axis=-1, keepdims=True)          # two-pass variance
    y = xc * jax.lax.rsqrt(var + 1e-5)
    return y * g_ref[...].astype(jnp.float32) + b_ref[...].astype(jnp.float32)


def _prenorm_resident_kernel(x_ref, g_ref, b_ref, w_ref, wb_ref, o_ref, *,
                             matmul_dtype):
    # Weight fully VMEM-resident: LN feeds the MXU directly (no scratch).
    y = _layernorm_f32(x_ref, g_ref, b_ref)
    out = jnp.dot(y.astype(matmul_dtype), w_ref[...],
                  preferred_element_type=jnp.float32)
    out = out + wb_ref[...].astype(jnp.float32)
    o_ref[...] = out.astype(o_ref.dtype)


def _prenorm_tiled_kernel(x_ref, g_ref, b_ref, w_ref, wb_ref, o_ref, y_ref):
    # Grid = (row tiles, weight-column tiles); column axis is the inner loop.
    # LayerNorm is computed once per row tile (at j == 0) and cached in VMEM.
    @pl.when(pl.program_id(1) == 0)
    def _():
        y_ref[...] = _layernorm_f32(x_ref, g_ref, b_ref).astype(y_ref.dtype)

    out = jnp.dot(y_ref[...], w_ref[...], preferred_element_type=jnp.float32)
    out = out + wb_ref[...].astype(jnp.float32)
    o_ref[...] = out.astype(o_ref.dtype)


def prenorm(x, gamma, beta, w, wb, *, tm=None, tn=None, matmul_dtype=None,
            column_tiled=None):
    """x: (B, N, D). Returns fn(LayerNorm(x)) with fn = Linear(D, D)."""
    B, N, D = x.shape
    M = B * N
    out_dtype = x.dtype

    # MXU dtype: never upcast a low-precision weight; force bf16 for f32 inputs
    # (f32-accumulated bf16 matmul runs at full MXU rate on v5e/v6e/v7x).
    if matmul_dtype is None:
        if x.dtype == jnp.float32 and w.dtype == jnp.float32:
            matmul_dtype = jnp.bfloat16
        else:
            matmul_dtype = (w.dtype
                            if jnp.dtype(w.dtype).itemsize <= jnp.dtype(x.dtype).itemsize
                            else x.dtype)
    matmul_dtype = jnp.dtype(matmul_dtype)

    # Per-generation VMEM budget.
    vmem_cap = _vmem_capacity_bytes()
    if vmem_cap >= (96 << 20):        # v5e / v6e: 128 MiB physical VMEM
        vmem_limit = 100 << 20
        resident_threshold = 40 << 20
    else:                             # v7x: 64 MiB per TC -> leave headroom
        vmem_limit = 52 << 20
        resident_threshold = 16 << 20

    w_bytes = D * D * matmul_dtype.itemsize
    if column_tiled is None:
        column_tiled = (D % 128 == 0) and (w_bytes > resident_threshold)
    # TODO(synk): a weight too large for residency with D % 128 != 0 would need
    # a padded column-tiled fallback; not needed for realistic ViT dims.

    x2 = x.reshape(M, D)
    gamma2 = gamma.reshape(1, D)
    beta2 = beta.reshape(1, D)
    wb2 = wb.reshape(1, D)
    w2 = w.astype(matmul_dtype)

    # Row tile: big for MXU occupancy (512 when the weight is being streamed),
    # 8-aligned, and capped so there are >= 2 row tiles whenever M allows it
    # so the "parallel" row axis can feed both v7x TensorCores.
    if tm is None:
        tm = 512 if column_tiled else 256
    half_rows = _round_up(max((M + 1) // 2, 8), 8)
    tm_eff = max(8, min(_round_up(tm, 8), half_rows, _round_up(M, 8)))

    if not column_tiled:
        grid = (pl.cdiv(M, tm_eff),)
        kernel = functools.partial(_prenorm_resident_kernel,
                                   matmul_dtype=matmul_dtype)
        in_specs = [
            pl.BlockSpec((tm_eff, D), lambda i: (i, 0)),             # x rows
            _spec((1, D), lambda i: (0, 0), single_buffered=True),   # gamma
            _spec((1, D), lambda i: (0, 0), single_buffered=True),   # beta
            _spec((D, D), lambda i: (0, 0), single_buffered=True),   # resident W
            _spec((1, D), lambda i: (0, 0), single_buffered=True),   # fn bias
        ]
        out_specs = pl.BlockSpec((tm_eff, D), lambda i: (i, 0))
        scratch_shapes = []
        dim_sem = ("parallel",)
    else:
        if tn is None:
            tn = next(c for c in (512, 256, 128) if D % c == 0)
        tn = min(tn, D)
        grid = (pl.cdiv(M, tm_eff), D // tn)
        kernel = _prenorm_tiled_kernel
        in_specs = [
            pl.BlockSpec((tm_eff, D), lambda i, j: (i, 0)),           # x rows
            _spec((1, D), lambda i, j: (0, 0), single_buffered=True), # gamma
            _spec((1, D), lambda i, j: (0, 0), single_buffered=True), # beta
            pl.BlockSpec((D, tn), lambda i, j: (0, j)),               # W columns
            pl.BlockSpec((1, tn), lambda i, j: (0, j)),               # bias cols
        ]
        out_specs = pl.BlockSpec((tm_eff, tn), lambda i, j: (i, j))
        scratch_shapes = [pltpu.VMEM((tm_eff, D), matmul_dtype)]      # cached LN(x)
        dim_sem = ("parallel", "arbitrary")

    out = pl.pallas_call(
        kernel,
        out_shape=jax.ShapeDtypeStruct((M, D), out_dtype),
        grid_spec=pltpu.PrefetchScalarGridSpec(
            num_scalar_prefetch=0,
            grid=grid,
            in_specs=in_specs,
            out_specs=out_specs,
            scratch_shapes=scratch_shapes,
        ),
        compiler_params=pltpu.CompilerParams(
            dimension_semantics=dim_sem,
            vmem_limit_bytes=vmem_limit,
        ),
    )(x2, gamma2, beta2, w2, wb2)

    return out.reshape(B, N, D)


def prenorm_ref(x, gamma, beta, w, wb):
    xf = x.astype(jnp.float32)
    mean = jnp.mean(xf, axis=-1, keepdims=True)
    var = jnp.mean((xf - mean) ** 2, axis=-1, keepdims=True)
    xn = (xf - mean) * jax.lax.rsqrt(var + 1e-5)
    y = xn * gamma.astype(jnp.float32) + beta.astype(jnp.float32)
    out = jnp.dot(y, w.astype(jnp.float32), precision=jax.lax.Precision.HIGHEST)
    return (out + wb.astype(jnp.float32)).astype(x.dtype)


def _make_inputs(key, B, N, D):
    kx, kw, kb = jax.random.split(key, 3)
    x = jax.random.normal(kx, (B, N, D), dtype=jnp.float32)
    gamma = jnp.ones((D,), jnp.float32)          # PyTorch LayerNorm init
    beta = jnp.zeros((D,), jnp.float32)
    w = jax.random.normal(kw, (D, D), dtype=jnp.float32) * 0.02  # fn = Linear(D, D)
    wb = jax.random.normal(kb, (D,), dtype=jnp.float32) * 0.01
    return x, gamma, beta, w, wb


if __name__ == "__main__":
    key = jax.random.PRNGKey(0)
    k1, k2, k3 = jax.random.split(key, 3)
    # Tolerances sized for the bf16 MXU path (f32 accumulation).
    tol = dict(atol=2e-2, rtol=2e-2)

    # Case 1: lane-dense hidden dim, resident-weight kernel, multiple row tiles.
    B, N, D = 2, 8, 128
    x, gamma, beta, w, wb = _make_inputs(k1, B, N, D)
    out = prenorm(x, gamma, beta, w, wb)
    jax.block_until_ready(out)
    ref = prenorm_ref(x, gamma, beta, w, wb)
    assert out.shape == (B, N, D)
    assert jnp.allclose(out, ref, **tol)

    # Case 2: non-multiple-of-128 hidden dim: full-width (unpadded) blocks.
    B2, N2, D2 = 2, 8, 96
    x2, gamma2, beta2, w2, wb2 = _make_inputs(k2, B2, N2, D2)
    out2 = prenorm(x2, gamma2, beta2, w2, wb2)
    jax.block_until_ready(out2)
    ref2 = prenorm_ref(x2, gamma2, beta2, w2, wb2)
    assert out2.shape == (B2, N2, D2)
    assert jnp.allclose(out2, ref2, **tol)

    # Case 3: force the column-tiled path (LN cached in VMEM scratch).
    B3, N3, D3 = 2, 8, 256
    x3, gamma3, beta3, w3, wb3 = _make_inputs(k3, B3, N3, D3)
    out3 = prenorm(x3, gamma3, beta3, w3, wb3, column_tiled=True, tn=128)
    jax.block_until_ready(out3)
    ref3 = prenorm_ref(x3, gamma3, beta3, w3, wb3)
    assert out3.shape == (B3, N3, D3)
    assert jnp.allclose(out3, ref3, **tol)

    print("KERNEL_OK")
</pallas_src>

<mosaic_0001>
module attributes {stable_mosaic.version = 11 : i64} {
  func.func @_prenorm_resident_kernel(%arg0: i32, %arg1: memref<8x128xf32, #tpu.memory_space<vmem>>, %arg2: memref<1x128xf32, #tpu.memory_space<vmem>>, %arg3: memref<1x128xf32, #tpu.memory_space<vmem>>, %arg4: memref<128x128xbf16, #tpu.memory_space<vmem>>, %arg5: memref<1x128xf32, #tpu.memory_space<vmem>>, %arg6: memref<8x128xf32, #tpu.memory_space<vmem>>) attributes {dimension_semantics = [#tpu.dimension_semantics<parallel>], iteration_bounds = array<i64: 2>, scalar_prefetch = 0 : i64, scratch_operands = 0 : i64, tpu.core_type = #tpu.core_type<tc>, window_params = [{transform_indices = @transform_0, window_bounds = array<i64: 8, 128>}, {pipeline_mode = #tpu.pipeline_mode<synchronous>, transform_indices = @transform_1, window_bounds = array<i64: 1, 128>}, {pipeline_mode = #tpu.pipeline_mode<synchronous>, transform_indices = @transform_2, window_bounds = array<i64: 1, 128>}, {pipeline_mode = #tpu.pipeline_mode<synchronous>, transform_indices = @transform_3, window_bounds = array<i64: 128, 128>}, {pipeline_mode = #tpu.pipeline_mode<synchronous>, transform_indices = @transform_4, window_bounds = array<i64: 1, 128>}, {transform_indices = @transform_5, window_bounds = array<i64: 8, 128>}]} {
    %c0 = arith.constant 0 : index
    %c0_0 = arith.constant 0 : index
    %0 = vector.load %arg1[%c0, %c0_0] : memref<8x128xf32, #tpu.memory_space<vmem>>, vector<8x128xf32>
    %cst = arith.constant dense<0.000000e+00> : vector<8xf32>
    %1 = vector.multi_reduction <add>, %0, %cst [1] : vector<8x128xf32> to vector<8xf32>
    %2 = vector.shape_cast %1 : vector<8xf32> to vector<8x1xf32>
    %cst_1 = arith.constant 1.280000e+02 : f32
    %3 = vector.broadcast %cst_1 : f32 to vector<8x1xf32>
    %4 = arith.divf %2, %3 : vector<8x1xf32>
    %5 = vector.broadcast %4 : vector<8x1xf32> to vector<8x128xf32>
    %6 = arith.subf %0, %5 : vector<8x128xf32>
    %7 = arith.mulf %6, %6 : vector<8x128xf32>
    %cst_2 = arith.constant dense<0.000000e+00> : vector<8xf32>
    %8 = vector.multi_reduction <add>, %7, %cst_2 [1] : vector<8x128xf32> to vector<8xf32>
    %9 = vector.shape_cast %8 : vector<8xf32> to vector<8x1xf32>
    %cst_3 = arith.constant 1.280000e+02 : f32
    %10 = vector.broadcast %cst_3 : f32 to vector<8x1xf32>
    %11 = arith.divf %9, %10 : vector<8x1xf32>
    %cst_4 = arith.constant 9.99999974E-6 : f32
    %12 = vector.broadcast %cst_4 : f32 to vector<8x1xf32>
    %13 = arith.addf %11, %12 : vector<8x1xf32>
    %14 = math.rsqrt %13 : vector<8x1xf32>
    %15 = vector.broadcast %14 : vector<8x1xf32> to vector<8x128xf32>
    %16 = arith.mulf %6, %15 : vector<8x128xf32>
    %c0_5 = arith.constant 0 : index
    %c0_6 = arith.constant 0 : index
    %17 = vector.load %arg2[%c0_5, %c0_6] : memref<1x128xf32, #tpu.memory_space<vmem>>, vector<1x128xf32>
    %18 = vector.broadcast %17 : vector<1x128xf32> to vector<8x128xf32>
    %19 = arith.mulf %16, %18 : vector<8x128xf32>
    %c0_7 = arith.constant 0 : index
    %c0_8 = arith.constant 0 : index
    %20 = vector.load %arg3[%c0_7, %c0_8] : memref<1x128xf32, #tpu.memory_space<vmem>>, vector<1x128xf32>
    %21 = vector.broadcast %20 : vector<1x128xf32> to vector<8x128xf32>
    %22 = arith.addf %19, %21 : vector<8x128xf32>
    %23 = arith.truncf %22 : vector<8x128xf32> to vector<8x128xbf16>
    %c0_9 = arith.constant 0 : index
    %c0_10 = arith.constant 0 : index
    %24 = vector.load %arg4[%c0_9, %c0_10] : memref<128x128xbf16, #tpu.memory_space<vmem>>, vector<128x128xbf16>
    %cst_11 = arith.constant dense<0.000000e+00> : vector<8x128xf32>
    %25 = tpu.matmul %23, %24, %cst_11 {dimension_numbers = #tpu.dot_dimension_numbers<[1], [0], [0], [1], [0, 0, 1, 1], [], []>} : vector<8x128xbf16>, vector<128x128xbf16>, vector<8x128xf32> -> vector<8x128xf32>
    %c0_12 = arith.constant 0 : index
    %c0_13 = arith.constant 0 : index
    %26 = vector.load %arg5[%c0_12, %c0_13] : memref<1x128xf32, #tpu.memory_space<vmem>>, vector<1x128xf32>
    %27 = vector.broadcast %26 : vector<1x128xf32> to vector<8x128xf32>
    %28 = arith.addf %25, %27 : vector<8x128xf32>
    %c0_14 = arith.constant 0 : index
    %c0_15 = arith.constant 0 : index
    %29 = vector.load %arg6[%c0_14, %c0_15] : memref<8x128xf32, #tpu.memory_space<vmem>>, vector<8x128xf32>
    tpu.vector_store %arg6[%c0_14, %c0_15], %28 {strides = array<i32>} : memref<8x128xf32, #tpu.memory_space<vmem>>, vector<8x128xf32>,
    return
  }
  func.func @transform_0(%arg0: i32) -> (i32, i32) {
    %c0_i32 = arith.constant 0 : i32
    %c0_i32_0 = arith.constant 0 : i32
    return %arg0, %c0_i32 : i32, i32
  }
  func.func @transform_1(%arg0: i32) -> (i32, i32) {
    %c0_i32 = arith.constant 0 : i32
    %c0_i32_0 = arith.constant 0 : i32
    %c0_i32_1 = arith.constant 0 : i32
    return %c0_i32, %c0_i32_0 : i32, i32
  }
  func.func @transform_2(%arg0: i32) -> (i32, i32) {
    %c0_i32 = arith.constant 0 : i32
    %c0_i32_0 = arith.constant 0 : i32
    %c0_i32_1 = arith.constant 0 : i32
    return %c0_i32, %c0_i32_0 : i32, i32
  }
  func.func @transform_3(%arg0: i32) -> (i32, i32) {
    %c0_i32 = arith.constant 0 : i32
    %c0_i32_0 = arith.constant 0 : i32
    %c0_i32_1 = arith.constant 0 : i32
    return %c0_i32, %c0_i32_0 : i32, i32
  }
  func.func @transform_4(%arg0: i32) -> (i32, i32) {
    %c0_i32 = arith.constant 0 : i32
    %c0_i32_0 = arith.constant 0 : i32
    %c0_i32_1 = arith.constant 0 : i32
    return %c0_i32, %c0_i32_0 : i32, i32
  }
  func.func @transform_5(%arg0: i32) -> (i32, i32) {
    %c0_i32 = arith.constant 0 : i32
    %c0_i32_0 = arith.constant 0 : i32
    return %arg0, %c0_i32 : i32, i32
  }
}

</mosaic_0001>

<bundles_post_ra>
// kernel: tpu_custom_call.1
= control target key start
LH: loop header
LB: loop body
LE: loop exit
PB: predicated region body
PF: predicated region fallthrough
CT: control target
= control target key end

     0   :  { %10 = vsyncpa [#allocation3], 0  ;;  %s993_s0 = inlined_call_operand.hbm [shape: f32[16,128], index: 0, kind: input, shape index: {}]   ;;  %s994_s1 = inlined_call_operand.vmem [shape: f32[1,128], index: 1, kind: input, shape index: {}]   ;;  %s995_s2 = inlined_call_operand.vmem [shape: f32[1,128], index: 2, kind: input, shape index: {}]   ;;  %s996_s3 = inlined_call_operand.hbm [shape: bf16[128,128], index: 3, kind: input, shape index: {}]   ;;  %s997_s4 = inlined_call_operand.vmem [shape: f32[1,128], index: 4, kind: input, shape index: {}]   ;;  %s998_s5 = inlined_call_operand.hbm [shape: f32[16,128], index: 5, kind: output, shape index: {}]  }
   0x1   :  { %12 = vsyncpa [#allocation3 + $0x1], 0 }
   0x2   :  { %13 = vsyncpa [#allocation6], 0 }
   0x3   :  { %14 = vsyncpa [#allocation4], 0 }
   0x4   :  { %16 = vsyncpa [#allocation4 + $0x1], 0  ;;  %s784_s18 = smov 0   ;;  %s786_s19 = smov 0  }
   0x5   :  { %s788_s20 = smov 0   ;;  %s790_s21 = smov 0  }
   0x6 LB: > { %s805_s22 = sadd.s32 4294967295, %s745_s21   ;;  %s492_s23 = sadd.s32 4294967294, %s745_s21   ;;  %s745_s21 = sphi %s790_s21, %s1018_s21   ;;  %s741_s20 = sphi %s788_s20, %s1017_s20   ;;  %s737_s19 = sphi %s786_s19, %s1016_s19   ;;  %s733_s18 = sphi %s784_s18, %s1015_s18  }
   0x7   : > { %p42_p0 = scmp.ne.s32.totalorder %s737_s19, %s733_s18  ;;  %p999_p1 = scmp.eq.s32.totalorder %s805_s22, 0 }
   0x8   : > { %p156_p3 = scmp.eq.s32.totalorder %s492_s23, 1  ;;  %p493_p5 = scmp.ge.s32.totalorder %s745_s21, 1 }
   0x9   : > { %p814_p4 = por %p999_p1, %p42_p0  ;;  %p163_p7 = scmp.lt.s32.totalorder %s745_s21, 3 }
   0xa   : > { %p819_p6 = por %p156_p3, %p42_p0  ;;  %s747_s27 = smov [#allocation5]  }
   0xb   : > { %s1002_s24 = scalar_select %p814_p4, 1, 0 }
   0xc   : > { %s1003_s25 = scalar_select %p819_p6, 1, 0 }
   0xd   : > { %p824_p8 = pnand %p493_p5, %p163_p7  ;;  %s181_s28 = sshll.u32 %s747_s27, 4  ;;  %s828_s28 = int_to_ptr.vmem [resolvable:$true] %s181_s28 }
   0xe   : > { %s840_s30 = sadd.s32 1, %s745_s21   ;;  %s29_s6 = sadd.s32 1, %s741_s20 }
   0xf   : > { %s1004_s26 = scalar_select %p824_p8, 1, 0 }
  0x10   : > { %p554_p9 = pneg %p824_p8  ;;  %s26_s7 = ssub.s32 %s745_s21, %s840_s30 }
  0x11   : > { %s617_s10 = scalar_lea.hbm %s996_s3, 1024 }
  0x12   : > { %p835_p11 = pnand %p554_p9, %p999_p1  ;;  %p618_p12 = scmp.ne.s32.totalorder %s996_s3, %s617_s10 }
  0x13   : > { %p624_p5 = scmp.lt.u32.totalorder %s617_s10, %s996_s3 }
  0x14   : > { %p619_p13 = pneg %p835_p11 }
  0x16   : > { %p620_p0 = pnand %p619_p13, %p618_p12 }
  0x18   : > { %p621_p3 = pneg %p620_p0 }
  0x1a   : > { %p626_p7 = pnand %p624_p5, %p621_p3 }
  0x1c   : > { %629 = shalt.err (!%p626_p7)
}
  0x1d   : > { %s630_s15 = scalar_lea.vmem %s828_s28, 1024  ;;  %p638_p2 = scmp.lt.s32.totalorder %s828_s28, %s828_s28 }
  0x1e   : > { %p631_p9 = scmp.ne.s32.totalorder %s828_s28, %s630_s15  ;;  %p639_p6 = scmp.lt.s32.totalorder %s630_s15, %s630_s15 }
  0x20   : > { %p633_p10 = pnand %p631_p9, %p619_p13  ;;  %p640_p4 = por %p639_p6, %p638_p2 }
  0x22   : > { %p634_p1 = pneg %p633_p10 }
  0x24   : > { %p641_p8 = pnand %p640_p4, %p634_p1 }
  0x26   : > { %644 = shalt.err (!%p641_p8)
}
  0x27   : > { %s748_s16 = smov 64   ;;  %s749_s17 = smov 4  }
  0x28   : > { %557 = dma.hbm_to_vmem [thread:$0]  (!%p835_p11), %s996_s3, 1024, %s828_s28, [#allocation6], %s748_s16, %s748_s16, %s749_s17  }
  0x29   : > { %p27_p2 = scmp.eq.s32.totalorder %s26_s7, 0  ;;  %p36_p1 = scmp.ne.s32.totalorder %s741_s20, %s737_s19 }
  0x2a   : > { %p37_p4 = scmp.eq.s32.totalorder %s745_s21, 0  ;;  %p567_p6 = scmp.lt.s32.totalorder %s745_s21, 2 }
  0x2b   : > { %s871_s8 = scalar_select %p27_p2, %s741_s20, %s29_s6  }
  0x2c   : > { %p38_p8 = por %p37_p4, %p36_p1  ;;  %p1006_p10 = scmp.eq.s32.totalorder %s805_s22, 1 }
  0x2d   : > { %s198_s10 = sand.u32 1, %s741_s20   ;;  %s497_s11 = sshll.u32 %s745_s21, 7 }
  0x2e   : > { %p875_p12 = por %p1006_p10, %p36_p1  ;;  %s496_s12 = sshll.u32 %s198_s10, 3 }
  0x2f   : > { %s884_s14 = scalar_lea.hbm %s993_s0, %s497_s11  ;;  %s202_s28 = scalar_lea.vmem [#allocation2], %s496_s12 }
  0x30   : > { %s209_s6 = sshll.u32 %s202_s28, 4  ;;  %p886_p11 = pnand %p567_p6, %p38_p8  ;;  %s890_s6 = int_to_ptr.vmem [resolvable:$true] %s209_s6 }
  0x31   : > { %s199_s15 = scalar_lea.sflag [#allocation3], %s198_s10  ;;  %s645_s16 = scalar_lea.hbm %s884_s14, 128 }
  0x32   : > { %p646_p13 = scmp.ne.s32.totalorder %s884_s14, %s645_s16  ;;  %p647_p0 = pneg %p886_p11 }
  0x33   : > { %s650_s27 = scalar_lea.hbm %s993_s0, 256  ;;  %p651_p7 = scmp.lt.u32.totalorder %s884_s14, %s993_s0 }
  0x34   : > { %p648_p3 = pnand %p647_p0, %p646_p13  ;;  %p652_p9 = scmp.lt.u32.totalorder %s650_s27, %s645_s16 }
  0x35   : > { %p654_p1 = scmp.lt.u32.totalorder %s645_s16, %s884_s14 }
  0x36   : > { %p649_p5 = pneg %p648_p3  ;;  %p653_p2 = por %p652_p9, %p651_p7 }
  0x38   : > { %p655_p4 = por %p654_p1, %p653_p2 }
  0x3a   : > { %p656_p6 = pnand %p655_p4, %p649_p5 }
  0x3c   : > { %659 = shalt.err (!%p656_p6)
}
  0x3d   : > { %s660_s10 = scalar_lea.vmem %s890_s6, 128  ;;  %s750_s29 = smov [#allocation2]  }
  0x3e   : > { %p661_p8 = scmp.ne.s32.totalorder %s890_s6, %s660_s10  ;;  %s665_s13 = sshll.u32 %s750_s29, 4  ;;  %s666_s13 = int_to_ptr.vmem [resolvable:$false] %s665_s13 }
  0x3f   : > { %s667_s28 = scalar_lea.vmem %s666_s13, 256  ;;  %p668_p3 = scmp.lt.s32.totalorder %s890_s6, %s666_s13 }
  0x40   : > { %p663_p10 = pnand %p661_p8, %p647_p0  ;;  %p669_p7 = scmp.lt.s32.totalorder %s667_s28, %s660_s10 }
  0x42   : > { %p664_p13 = pneg %p663_p10  ;;  %p670_p9 = por %p669_p7, %p668_p3 }
  0x44   : > { %p671_p2 = pnand %p670_p9, %p664_p13 }
  0x46   : > { %674 = shalt.err (!%p671_p2)
}
  0x47   : > { %561 = dma.hbm_to_vmem [thread:$0]  (!%p886_p11), %s884_s14, 128, %s890_s6, %s199_s15  }
  0x48   : > { %p1009_p5 = scmp.ne.s32.totalorder %s1004_s26, 0 }
  0x49   : > { %s920_s16 = sand.u32 (!%p1009_p5), 1, %s737_s19   ;;  %p1010_p0 = scmp.ne.s32.totalorder (!%p1009_p5), %s1002_s24, 0 }
  0x4a   : > { %218 = sbr.rel (%p1009_p5) target bundleno = 627 (0x273), region = 40  ;;  %s499_s17 = sshll.u32 (!%p1009_p5), %s920_s16, 3 }
  0x4b   : > { %s221_s23 = scalar_lea.sflag (!%p1009_p5), [#allocation3], %s920_s16  ;;  %s224_s27 = scalar_lea.vmem (!%p1009_p5), [#allocation2], %s499_s17 }
  0x51   : > { %720 = dma.done.wait (%p1010_p0), %s221_s23, 128  }
  0x52   : > { %722 = vsyncadd (%p1010_p0), %s221_s23, 4294967168  ;;  %p1011_p11 = scmp.eq.s32.totalorder %s805_s22, 0 }
  0x54   : > { %724 = dma.done.wait (%p1011_p11), [#allocation6], 1024   ;;  %p1012_p1 = pmov %p1011_p11 }
  0x55   : > { %v256_v0 = vld [vmem:[%s224_s27] sm:$0xff]  ;;  %v607_v1 = vld [vmem:[#allocation5] sm:$0xff]   ;;  %v751_v2 = vmov 0.0   ;;  %v608_v3 = vld [vmem:[#allocation5 + $0x8] sm:$0xff]   ;;  %vm752_vm0 = vmmov 0   ;;  %s514_s11 = sshll.u32 %s805_s22, 7 }
  0x56   : > { %726 = vsyncadd (%p1012_p1), [#allocation6], 4294966272  ;;  %257 = vadd.xlane.f32.xlu0 %v256_v0  ;;  %526 = vmatprep.subr.bf16.mxu0 %v751_v2  ;;  %v609_v8 = vld [vmem:[#allocation5 + $0x10] sm:$0xff]   ;;  %v610_v9 = vld [vmem:[#allocation5 + $0x18] sm:$0xff]   ;;  %s254_s12 = scalar_lea.vmem [#allocation7], %s499_s17  ;;  %s949_s28 = scalar_lea.hbm %s998_s5, %s514_s11 }
  0x57   : > { %527 = vmatpush3.bf16.msra.mxu0 %v607_v1  ;;  %v611_v10 = vld [vmem:[#allocation5 + $0x20] sm:$0xff]   ;;  %542 = vmatprep.mubr.msk.bf16.mxu0 %vm752_vm0, %v751_v2  ;;  %v612_v11 = vld [vmem:[#allocation5 + $0x28] sm:$0xff]   ;;  %v613_v12 = vld [vmem:[#allocation5 + $0x30] sm:$0xff]   ;;  %s412_s10 = sshll.u32 %s254_s12, 4  ;;  %s399_s22 = scalar_lea.sflag [#allocation4], %s920_s16  ;;  %s951_s10 = int_to_ptr.vmem [resolvable:$true] %s412_s10 }
  0x58   : > { %528 = vmatprep.subr.bf16.mxu0 %v751_v2  ;;  %v614_v13 = vld [vmem:[#allocation5 + $0x38] sm:$0xff]   ;;  %v502_v18 = vld [vmem:[%s994_s1] ss:$0 sm:$0xff]  ;;  %s675_s23 = scalar_lea.vmem %s951_s10, 128  ;;  %s753_s17 = smov [#allocation7]  }
  0x59   : > { %v503_v20 = vld [vmem:[%s995_s2] ss:$0 sm:$0xff]  ;;  %p676_p4 = scmp.ne.s32.totalorder %s951_s10, %s675_s23  ;;  %s679_s27 = sshll.u32 %s753_s17, 4  ;;  %s680_s27 = int_to_ptr.vmem [resolvable:$false] %s679_s27 }
  0x5a   : > { %v504_v24 = vld [vmem:[%s997_s4] ss:$0 sm:$0xff]  ;;  %s681_s24 = scalar_lea.vmem %s680_s27, 256  ;;  %p682_p10 = scmp.lt.s32.totalorder %s951_s10, %s680_s27 }
  0x5b   : > { %529 = vmatpush3.bf16.msra.mxu0 %v608_v3  ;;  %p677_p6 = pnand %p676_p4, %p875_p12  ;;  %p683_p13 = scmp.lt.s32.totalorder %s681_s24, %s675_s23 }
  0x5c   : > { %530 = vmatprep.subr.bf16.mxu0 %v751_v2 }
  0x5d   : > { %p678_p8 = pneg %p677_p6  ;;  %p684_p3 = por %p683_p13, %p682_p10 }
  0x5f   : > { %531 = vmatpush3.bf16.msra.mxu0 %v609_v8  ;;  %p685_p7 = pnand %p684_p3, %p678_p8 }
  0x60   : > { %532 = vmatprep.subr.bf16.mxu0 %v751_v2 }
  0x63   : > { %533 = vmatpush3.bf16.msra.mxu0 %v610_v9 }
  0x64   : > { %534 = vmatprep.subr.bf16.mxu0 %v751_v2 }
  0x67   : > { %535 = vmatpush3.bf16.msra.mxu0 %v611_v10 }
  0x68   : > { %536 = vmatprep.subr.bf16.mxu0 %v751_v2 }
  0x6b   : > { %537 = vmatpush3.bf16.msra.mxu0 %v612_v11 }
  0x6c   : > { %538 = vmatprep.subr.bf16.mxu0 %v751_v2 }
  0x6f   : > { %539 = vmatpush3.bf16.msra.mxu0 %v613_v12 }
  0x70   : > { %540 = vmatprep.subr.bf16.mxu0 %v751_v2 }
  0x73   : > { %541 = vmatpush3.bf16.msra.mxu0 %v614_v13 }
  0xe3   : > { %v258_v4 = vpop.xlane.xlu0 %257 }
  0xe4   : > { %v260_v5 = vmul.f32 0.0078125, %v258_v4 }
  0xe6   : > { %v261_v6 = vsub.f32 %v256_v0, %v260_v5 }
  0xe8   : > { %v262_v7 = vmul.f32 %v261_v6, %v261_v6 }
  0xea   : > { %263 = vadd.xlane.f32.xlu0 %v262_v7 }
 0x177   : > { %v264_v14 = vpop.xlane.xlu0 %263 }
 0x178   : > { %v265_v15 = vmul.f32 0.0078125, %v264_v14 }
 0x17a   : > { %v266_v16 = vadd.f32 1e-05, %v265_v15 }
 0x17c   : > { %615 = vrsqrt.f32 %v266_v16 }
 0x186   : > { %v616_v17 = vpop.eup %615 }
 0x187   : > { %v268_v19 = vmul.f32 %v616_v17, %v261_v6 }
 0x189   : > { %v276_v21 = vmul.f32 %v502_v18, %v268_v19 }
 0x18b   : > { %v284_v22 = vadd.f32 %v503_v20, %v276_v21 }
 0x18d   : > { %v285_v23 = vpack.c.bf16 %v284_v22, %v284_v22 }
 0x18f   : > { %543 = vmatmul.mubr.bf16.vlgmr.msra.gmra.mrb[0].mxu0 %v285_v23 }
 0x262   : > { %v391_v25 = vpop.f32.mrb[0].mxu0 }
 0x263   : > { %v392_v26 = vadd.f32 %v504_v24, %v391_v25  ;;  %v544_v27 = vpop.f32.mrb[1].mxu0 }
 0x264   : > { %v394_v28 = vpop.f32.mrb[2].mxu0 }
 0x265   : > { %397 = vst [vmem:[%s254_s12] sm:$0xff] %v392_v26  ;;  %v545_v29 = vpop.f32.mrb[3].mxu0 }
 0x266   : > { %688 = shalt.err (!%p685_p7)
}
 0x267   : > { %s689_s16 = scalar_lea.hbm %s949_s28, 128  ;;  %s693_s6 = scalar_lea.hbm %s998_s5, 256 }
 0x268   : > { %p690_p9 = scmp.ne.s32.totalorder %s949_s28, %s689_s16  ;;  %p694_p0 = scmp.lt.u32.totalorder %s949_s28, %s998_s5 }
 0x269   : > { %p695_p11 = scmp.lt.u32.totalorder %s693_s6, %s689_s16  ;;  %p697_p4 = scmp.lt.u32.totalorder %s689_s16, %s949_s28 }
 0x26a   : > { %p691_p2 = pnand %p690_p9, %p875_p12 }
 0x26b   : > { %p696_p1 = por %p695_p11, %p694_p0 }
 0x26c   : > { %p692_p5 = pneg %p691_p2 }
 0x26d   : > { %p698_p6 = por %p697_p4, %p696_p1 }
 0x26f   : > { %p699_p8 = pnand %p698_p6, %p692_p5 }
 0x271   : > { %702 = shalt.err (!%p699_p8)
}
 0x272   : > { %552 = dma.vmem_to_hbm [thread:$0]  (%p875_p12), %s951_s10, 128, %s949_s28, %s399_s22  }
 0x273 PF: > { %s424_s11 = sand.u32 1, %s733_s18   ;;  %p1013_p10 = scmp.ne.s32.totalorder %s1003_s25, 0 }
 0x274   : > { %p1014_p13 = scmp.ge.s32.totalorder %s745_s21, 2  ;;  %s425_s12 = scalar_lea.sflag [#allocation4], %s424_s11 }
 0x276   : > { %p563_p3 = pnand %p1014_p13, %p1013_p10 }
 0x278   : > { %728 = dma.done.wait (!%p563_p3), %s425_s12, 128  }
 0x279   : > { %730 = vsyncadd (!%p563_p3), %s425_s12, 4294967168  ;;  %p19_p7 = scmp.ge.s32.totalorder %s840_s30, 4   ;;  %s1015_s18 = smov %s737_s19 }
 0x27a   : > { %s1016_s19 = smov %s741_s20  ;;  %s1017_s20 = smov %s871_s8 }
 0x27b   : > { %s1018_s21 = smov %s840_s30  ;;  %21 = sbr.rel (!%p19_p7) target bundleno = 6 (0x6), region = 89 }
 0x282   :  { %430 = vsyncpa [#allocation3], 1 }
 0x283   :  { %432 = vsyncpa [#allocation3 + $0x1], 1 }
 0x284   :  { %433 = vsyncpa [#allocation6], 1 }
 0x285   :  { %434 = vsyncpa [#allocation4], 1 }
 0x286   :  { %436 = vsyncpa [#allocation4 + $0x1], 1 }

</bundles_post_ra>
